<compile_context>
chip_gen: v6e
topology: v6e:2x2x1
jax: 0.10.0
libtpu: 0.0.40
codegen_flags: <defaults>
</compile_context>

<pallas_src>
import functools

import jax
import jax.numpy as jnp
from jax.experimental import pallas as pl
from jax.experimental.pallas import tpu as pltpu


def _round_up(a: int, b: int) -> int:
    return (a + b - 1) // b * b


def _embedding_kernel(x_ref, t_ref, wfc_ref, bfc_ref, wpos_ref, bpos_ref, o_ref):
    x = x_ref[...]                       # (TILE_M, D_in)  f32
    t = t_ref[...]                       # (TILE_M, 1)     f32

    # fc: Linear(input_dim, hidden) -- MXU matmul. K=D_in is tiny; under the
    # auto-pipelined DMA this kernel is HBM-write bound, not MXU bound.
    h = jnp.dot(x, wfc_ref[...], preferred_element_type=jnp.float32) + bfc_ref[...]

    # TimeEncoding: Linear(1, hidden) is a broadcasted scale + shift (VPU).
    p = t * wpos_ref[...] + bpos_ref[...]          # (TILE_M, H)

    # cat([p[:, 0:1], sin(p[:, 1:])], -1): column-0 mask as a (1, H) iota that
    # broadcasts in the where (avoids a full-tile iota + compare per vreg).
    col = jax.lax.broadcasted_iota(jnp.int32, (1, p.shape[-1]), 1)
    pos = jnp.where(col == 0, p, jnp.sin(p))

    # TODO(synk): dropout has p=0 in this module (identity); no RNG mask emitted.
    o_ref[...] = (h + pos).astype(o_ref.dtype)


def prepare_params(w_fc, b_fc, w_pos, b_pos):
    """One-time parameter prep (do NOT call per forward).

    Takes PyTorch-layout params:
      w_fc: (H, D_in), b_fc: (H,), w_pos: (H, 1), b_pos: (H,)
    Weights are transposed so the kernel does row-major x @ (D_in, H).  The
    hidden dim is left unpadded: for H a multiple of 128 the stores are
    lane-dense automatically; for small H this avoids 128/H write amplification
    (masked stores are cheaper than 4x the HBM traffic + a post-kernel slice).
    """
    H, D_in = w_fc.shape
    return {
        "wfc_t": jnp.transpose(w_fc),            # (D_in, H)
        "bfc": b_fc.reshape(1, H),               # (1, H)
        "wpos_t": jnp.transpose(w_pos),          # (1, H)
        "bpos": b_pos.reshape(1, H),             # (1, H)
        "H": H,
        "D_in": D_in,
    }


# Tiling knobs.
_TARGET_STEP_BYTES = 4 << 20   # ~4 MiB of output per grid step amortizes the
                               # ~0.35 us/step pipeline overhead on all gens.
_TILE_M_MIN = 512
_TILE_M_MAX = 8192
_VMEM_TILE_BUDGET = 24 << 20   # double-buffered tiles + resident weights must
                               # fit comfortably in v7x's 64 MiB physical VMEM.


@functools.partial(jax.jit, static_argnames=("H", "D_in", "out_dtype"))
def _embedding_forward_impl(x, times, wfc_t, bfc, wpos_t, bpos, *, H, D_in,
                            out_dtype):
    B, S, _ = x.shape
    M = B * S

    out_elem_bytes = jnp.dtype(out_dtype).itemsize
    bytes_per_row = 4 * (D_in + 1) + out_elem_bytes * H + 4 * H  # in + out + f32 compute slack
    weight_bytes = 4 * (D_in * H + 3 * H)

    # 1) Target bytes per grid step (dominated by the H-wide output write).
    tile_m = _round_up(max(_TARGET_STEP_BYTES // max(out_elem_bytes * H, 1), 8), 8)
    tile_m = max(_TILE_M_MIN, min(tile_m, _TILE_M_MAX))

    # 2) Per-generation-safe VMEM budget: 2x-buffered row tiles + resident weights.
    max_rows = max((_VMEM_TILE_BUDGET - weight_bytes) // (2 * bytes_per_row), 8)
    tile_m = min(tile_m, max(max_rows // 8 * 8, 8))

    # 3) Never exceed M; keep >= 2 grid steps when splittable so v7x's two
    #    TensorCores both get work under dimension_semantics=("parallel",).
    tile_m = min(tile_m, _round_up(M, 8))
    if tile_m >= M and M >= 16:
        tile_m = _round_up((M + 1) // 2, 8)

    grid_m = -(-M // tile_m)   # ragged last tile: Pallas masks the OOB rows.

    # Footprint-based VMEM limit (+50% margin); only exceed v5e's 16 MiB scoped
    # default when needed, and never request v7x's full 64 MiB.
    footprint = 2 * tile_m * bytes_per_row + weight_bytes
    vmem_limit = int(min(max(footprint * 3 // 2 + (1 << 20), 16 << 20), 48 << 20))

    x2 = x.reshape(M, D_in)          # views only; no wrapper-side padding/copies
    t2 = times.reshape(M, 1)

    out2 = pl.pallas_call(
        _embedding_kernel,
        out_shape=jax.ShapeDtypeStruct((M, H), out_dtype),
        grid=(grid_m,),
        in_specs=[
            pl.BlockSpec((tile_m, D_in), lambda i: (i, 0)),
            pl.BlockSpec((tile_m, 1), lambda i: (i, 0)),
            pl.BlockSpec((D_in, H), lambda i: (0, 0)),   # resident weight
            pl.BlockSpec((1, H), lambda i: (0, 0)),
            pl.BlockSpec((1, H), lambda i: (0, 0)),
            pl.BlockSpec((1, H), lambda i: (0, 0)),
        ],
        out_specs=pl.BlockSpec((tile_m, H), lambda i: (i, 0)),
        compiler_params=pltpu.CompilerParams(
            dimension_semantics=("parallel",),
            vmem_limit_bytes=vmem_limit,
        ),
    )(x2, t2, wfc_t, bfc, wpos_t, bpos)

    return out2.reshape(B, S, H)


def embedding_forward(x, times, params, out_dtype=jnp.float32):
    """x: (B, S, D_in) f32; times: (B, S, 1) f32; params from prepare_params.

    out_dtype=jnp.bfloat16 halves HBM write traffic (the dominant cost) at the
    price of ~1e-2 accuracy; default f32 keeps 1e-4 accuracy.
    Returns (B, S, H).
    """
    return _embedding_forward_impl(
        x, times, params["wfc_t"], params["bfc"], params["wpos_t"],
        params["bpos"], H=params["H"], D_in=params["D_in"], out_dtype=out_dtype)


def _reference(x, times, w_fc, b_fc, w_pos, b_pos):
    h = jnp.einsum("bsd,hd->bsh", x, w_fc) + b_fc
    p = jnp.einsum("bsd,hd->bsh", times, w_pos) + b_pos
    pos = jnp.concatenate([p[..., 0:1], jnp.sin(p[..., 1:])], axis=-1)
    return h + pos


if __name__ == "__main__":
    B, S, D_in, H = 2, 8, 16, 32

    key = jax.random.PRNGKey(0)
    k1, k2, k3, k4, k5, k6 = jax.random.split(key, 6)

    x = jax.random.normal(k1, (B, S, D_in), dtype=jnp.float32)
    times = jax.random.uniform(k2, (B, S, 1), dtype=jnp.float32)

    # PyTorch Linear-layout parameters.
    w_fc = jax.random.normal(k3, (H, D_in), dtype=jnp.float32) * 0.1
    b_fc = jax.random.normal(k4, (H,), dtype=jnp.float32) * 0.1
    w_pos = jax.random.normal(k5, (H, 1), dtype=jnp.float32) * 0.1
    b_pos = jax.random.normal(k6, (H,), dtype=jnp.float32) * 0.1

    # One-time parameter prep (transpose), not per forward call.
    params = prepare_params(w_fc, b_fc, w_pos, b_pos)

    out = embedding_forward(x, times, params)
    out = jax.block_until_ready(out)

    ref = _reference(x, times, w_fc, b_fc, w_pos, b_pos)
    assert out.shape == (B, S, H)
    assert jnp.max(jnp.abs(out - ref)) < 1e-4

    print("KERNEL_OK")
</pallas_src>

<mosaic_0001>
module attributes {stable_mosaic.version = 11 : i64} {
  func.func @_embedding_kernel(%arg0: i32, %arg1: memref<8x16xf32, #tpu.memory_space<vmem>>, %arg2: memref<8x1xf32, #tpu.memory_space<vmem>>, %arg3: memref<16x32xf32, #tpu.memory_space<vmem>>, %arg4: memref<1x32xf32, #tpu.memory_space<vmem>>, %arg5: memref<1x32xf32, #tpu.memory_space<vmem>>, %arg6: memref<1x32xf32, #tpu.memory_space<vmem>>, %arg7: memref<8x32xf32, #tpu.memory_space<vmem>>) attributes {dimension_semantics = [#tpu.dimension_semantics<parallel>], iteration_bounds = array<i64: 2>, scalar_prefetch = 0 : i64, scratch_operands = 0 : i64, tpu.core_type = #tpu.core_type<tc>, window_params = [{transform_indices = @transform_0, window_bounds = array<i64: 8, 16>}, {transform_indices = @transform_1, window_bounds = array<i64: 8, 1>}, {pipeline_mode = #tpu.pipeline_mode<synchronous>, transform_indices = @transform_2, window_bounds = array<i64: 16, 32>}, {pipeline_mode = #tpu.pipeline_mode<synchronous>, transform_indices = @transform_3, window_bounds = array<i64: 1, 32>}, {pipeline_mode = #tpu.pipeline_mode<synchronous>, transform_indices = @transform_4, window_bounds = array<i64: 1, 32>}, {pipeline_mode = #tpu.pipeline_mode<synchronous>, transform_indices = @transform_5, window_bounds = array<i64: 1, 32>}, {transform_indices = @transform_6, window_bounds = array<i64: 8, 32>}]} {
    %c0 = arith.constant 0 : index
    %c0_0 = arith.constant 0 : index
    %0 = vector.load %arg1[%c0, %c0_0] : memref<8x16xf32, #tpu.memory_space<vmem>>, vector<8x16xf32>
    %c0_1 = arith.constant 0 : index
    %c0_2 = arith.constant 0 : index
    %1 = vector.load %arg2[%c0_1, %c0_2] : memref<8x1xf32, #tpu.memory_space<vmem>>, vector<8x1xf32>
    %c0_3 = arith.constant 0 : index
    %c0_4 = arith.constant 0 : index
    %2 = vector.load %arg3[%c0_3, %c0_4] : memref<16x32xf32, #tpu.memory_space<vmem>>, vector<16x32xf32>
    %cst = arith.constant dense<0.000000e+00> : vector<8x32xf32>
    %3 = tpu.matmul %0, %2, %cst {dimension_numbers = #tpu.dot_dimension_numbers<[1], [0], [0], [1], [0, 0, 1, 1], [], []>} : vector<8x16xf32>, vector<16x32xf32>, vector<8x32xf32> -> vector<8x32xf32>
    %c0_5 = arith.constant 0 : index
    %c0_6 = arith.constant 0 : index
    %4 = vector.load %arg4[%c0_5, %c0_6] : memref<1x32xf32, #tpu.memory_space<vmem>>, vector<1x32xf32>
    %5 = vector.broadcast %4 : vector<1x32xf32> to vector<8x32xf32>
    %6 = arith.addf %3, %5 : vector<8x32xf32>
    %c0_7 = arith.constant 0 : index
    %c0_8 = arith.constant 0 : index
    %7 = vector.load %arg5[%c0_7, %c0_8] : memref<1x32xf32, #tpu.memory_space<vmem>>, vector<1x32xf32>
    %8 = vector.broadcast %1 : vector<8x1xf32> to vector<8x32xf32>
    %9 = vector.broadcast %7 : vector<1x32xf32> to vector<8x32xf32>
    %10 = arith.mulf %8, %9 : vector<8x32xf32>
    %c0_9 = arith.constant 0 : index
    %c0_10 = arith.constant 0 : index
    %11 = vector.load %arg6[%c0_9, %c0_10] : memref<1x32xf32, #tpu.memory_space<vmem>>, vector<1x32xf32>
    %12 = vector.broadcast %11 : vector<1x32xf32> to vector<8x32xf32>
    %13 = arith.addf %10, %12 : vector<8x32xf32>
    %14 = tpu.iota {dimensions = array<i32: 1>} : vector<1x32xi32>
    %c0_i32 = arith.constant 0 : i32
    %15 = vector.broadcast %c0_i32 : i32 to vector<1x32xi32>
    %16 = arith.cmpi eq, %14, %15 : vector<1x32xi32>
    %17 = math.sin %13 : vector<8x32xf32>
    %18 = vector.shape_cast %16 : vector<1x32xi1> to vector<1x32xi1>
    %19 = vector.broadcast %18 : vector<1x32xi1> to vector<8x32xi1>
    %20 = arith.select %19, %13, %17 : vector<8x32xi1>, vector<8x32xf32>
    %21 = arith.addf %6, %20 : vector<8x32xf32>
    %c0_11 = arith.constant 0 : index
    %c0_12 = arith.constant 0 : index
    %22 = vector.load %arg7[%c0_11, %c0_12] : memref<8x32xf32, #tpu.memory_space<vmem>>, vector<8x32xf32>
    tpu.vector_store %arg7[%c0_11, %c0_12], %21 {strides = array<i32>} : memref<8x32xf32, #tpu.memory_space<vmem>>, vector<8x32xf32>,
    return
  }
  func.func @transform_0(%arg0: i32) -> (i32, i32) {
    %c0_i32 = arith.constant 0 : i32
    %c0_i32_0 = arith.constant 0 : i32
    return %arg0, %c0_i32 : i32, i32
  }
  func.func @transform_1(%arg0: i32) -> (i32, i32) {
    %c0_i32 = arith.constant 0 : i32
    %c0_i32_0 = arith.constant 0 : i32
    return %arg0, %c0_i32 : i32, i32
  }
  func.func @transform_2(%arg0: i32) -> (i32, i32) {
    %c0_i32 = arith.constant 0 : i32
    %c0_i32_0 = arith.constant 0 : i32
    %c0_i32_1 = arith.constant 0 : i32
    return %c0_i32, %c0_i32_0 : i32, i32
  }
  func.func @transform_3(%arg0: i32) -> (i32, i32) {
    %c0_i32 = arith.constant 0 : i32
    %c0_i32_0 = arith.constant 0 : i32
    %c0_i32_1 = arith.constant 0 : i32
    return %c0_i32, %c0_i32_0 : i32, i32
  }
  func.func @transform_4(%arg0: i32) -> (i32, i32) {
    %c0_i32 = arith.constant 0 : i32
    %c0_i32_0 = arith.constant 0 : i32
    %c0_i32_1 = arith.constant 0 : i32
    return %c0_i32, %c0_i32_0 : i32, i32
  }
  func.func @transform_5(%arg0: i32) -> (i32, i32) {
    %c0_i32 = arith.constant 0 : i32
    %c0_i32_0 = arith.constant 0 : i32
    %c0_i32_1 = arith.constant 0 : i32
    return %c0_i32, %c0_i32_0 : i32, i32
  }
  func.func @transform_6(%arg0: i32) -> (i32, i32) {
    %c0_i32 = arith.constant 0 : i32
    %c0_i32_0 = arith.constant 0 : i32
    return %arg0, %c0_i32 : i32, i32
  }
}

</mosaic_0001>

<bundles_post_ra>
// kernel: _embedding_forward_impl.1
= control target key start
LH: loop header
LB: loop body
LE: loop exit
PB: predicated region body
PF: predicated region fallthrough
CT: control target
= control target key end

     0   :  { %11 = vsyncpa [#allocation3], 0  ;;  %s975_s0 = inlined_call_operand.vmem [shape: f32[16,16], index: 0, kind: input, shape index: {}]   ;;  %s976_s1 = inlined_call_operand.vmem [shape: f32[16,1], index: 1, kind: input, shape index: {}]   ;;  %s977_s2 = inlined_call_operand.hbm [shape: f32[16,32], index: 2, kind: input, shape index: {}]   ;;  %s978_s3 = inlined_call_operand.vmem [shape: f32[1,32], index: 3, kind: input, shape index: {}]   ;;  %s979_s4 = inlined_call_operand.vmem [shape: f32[1,32], index: 4, kind: input, shape index: {}]   ;;  %s980_s5 = inlined_call_operand.vmem [shape: f32[1,32], index: 5, kind: input, shape index: {}]   ;;  %s981_s6 = inlined_call_operand.hbm [shape: f32[16,32], index: 6, kind: output, shape index: {}]  }
   0x1   :  { %12 = vsyncpa [#allocation4], 0 }
   0x2   :  { %14 = vsyncpa [#allocation4 + $0x1], 0  ;;  %s836_s21 = smov 0   ;;  %s838_s22 = smov 0  }
   0x3   :  { %s840_s23 = smov 0   ;;  %s842_s24 = smov 0  }
   0x4 LB: > { %s857_s25 = sadd.s32 4294967295, %s786_s24   ;;  %s595_s26 = sadd.s32 4294967294, %s786_s24   ;;  %s786_s24 = sphi %s842_s24, %s989_s24   ;;  %s782_s23 = sphi %s840_s23, %s988_s23   ;;  %s778_s22 = sphi %s838_s22, %s987_s22   ;;  %s774_s21 = sphi %s836_s21, %s986_s21  }
   0x5   : > { %s861_s27 = sadd.s32 1, %s786_s24   ;;  %s163_s28 = sadd.s32 1, %s782_s23 }
   0x6   : > { %s160_s29 = ssub.s32 %s786_s24, %s861_s27  ;;  %p173_p0 = scmp.ne.s32.totalorder %s782_s23, %s778_s22 }
   0x7   : > { %p161_p1 = scmp.eq.s32.totalorder %s160_s29, 0  ;;  %p174_p2 = scmp.eq.s32.totalorder %s857_s25, 1 }
   0x8   : > { %p179_p3 = scmp.ne.s32.totalorder %s778_s22, %s774_s21  ;;  %p180_p4 = scmp.eq.s32.totalorder %s595_s26, 1 }
   0x9   : > { %s872_s30 = scalar_select %p161_p1, %s782_s23, %s163_s28  }
   0xa   : > { %p874_p5 = por %p174_p2, %p173_p0  ;;  %p878_p6 = por %p180_p4, %p179_p3 }
   0xb   : > { %p596_p7 = scmp.ge.s32.totalorder %s786_s24, 1  ;;  %p187_p8 = scmp.lt.s32.totalorder %s786_s24, 3 }
   0xc   : > { %s983_s8 = scalar_select %p878_p6, 1, 0 }
   0xd   : > { %p644_p9 = scmp.eq.s32.totalorder %s857_s25, 0  ;;  %p885_p10 = pnand %p596_p7, %p187_p8 }
   0xe   : > { %s788_s10 = smov [#allocation2]  }
   0xf   : > { %s199_s11 = sshll.u32 %s788_s10, 4  ;;  %p636_p11 = pneg %p885_p10  ;;  %s200_s11 = int_to_ptr.vmem [resolvable:$true] %s199_s11 }
  0x10   : > { %s707_s12 = scalar_lea.vmem %s200_s11, 256  ;;  %p715_p3 = scmp.lt.s32.totalorder %s200_s11, %s200_s11 }
  0x11   : > { %p637_p12 = pnand %p644_p9, %p636_p11  ;;  %p708_p0 = scmp.ne.s32.totalorder %s200_s11, %s707_s12 }
  0x12   : > { %p716_p4 = scmp.lt.s32.totalorder %s707_s12, %s707_s12 }
  0x13   : > { %p698_p13 = pneg %p637_p12 }
  0x14   : > { %p717_p6 = por %p716_p4, %p715_p3 }
  0x15   : > { %p710_p1 = pnand %p708_p0, %p698_p13 }
  0x17   : > { %p711_p2 = pneg %p710_p1 }
  0x19   : > { %p718_p7 = pnand %p717_p6, %p711_p2 }
  0x1b   : > { %721 = shalt.err (!%p718_p7)
}
  0x1c   : > { %s789_s13 = smov 128   ;;  %s790_s14 = smov 8  }
  0x1d   : > { %639 = dma.hbm_to_vmem [thread:$0]  (!%p637_p12), %s977_s2, 256, %s200_s11, [#allocation3], %s789_s13, %s789_s13, %s790_s14  }
  0x1e   : > { %238 = sbr.rel (%p885_p10) target bundleno = 269 (0x10d), region = 44 }
  0x23   : > { %765 = dma.done.wait (%p644_p9), [#allocation3], 256  }
  0x24   : > { %767 = vsyncadd (%p644_p9), [#allocation3], 4294967040  ;;  %p271_p8 = scmp.lt.s32.totalorder %s857_s25, 1  ;;  %v791_v0 = vmov 0   ;;  %v792_v1 = vmov 0.0   ;;  %vm793_vm0 = vmmov 0  }
  0x25   : > { %691 = vset.pattern.permute.xlu0 %v791_v0  ;;  %619 = vmatprep.subr.mxu0 %v792_v1  ;;  %v282_v3 = vld [vmem:[#allocation2 + $0x8] sm:$0xff]  ;;  %v281_v4 = vld [vmem:[#allocation2] sm:$0xff]  ;;  %vm290_vm1 = vcmask 130048   ;;  %v794_v21 = vmov 683565275   ;;  %s268_s14 = sand.u32 1, %s778_s22  }
  0x26   : > { %s272_s17 = scalar_select %p271_p8, %s857_s25, 1  ;;  %623 = vmatprep.mubr.msk.f32.mxu0 %vm793_vm0, %v792_v1  ;;  %620 = vmatpush3.msra.mxu0 %v282_v3  ;;  %v606_v6 = vld [vmem:[%s979_s4] ss:$0 sm:$0xff]  ;;  %v795_v23 = vmov 2475754826   ;;  %vm496_vm0 = vcmask 261120  }
  0x27   : > { %621 = vmatprep.subr.mxu0 %v792_v1  ;;  %v607_v7 = vld [vmem:[%s980_s5] ss:$0 sm:$0xff]  ;;  %v796_v26 = vmov 2131351028   ;;  %v797_v29 = vmov 2102212464  }
  0x28   : > { %s602_s18 = sshll.u32 %s272_s17, 3  ;;  %622 = vmatpush3.msra.mxu0 %v281_v4  ;;  %v798_v32 = vmov 920167782   ;;  %v799_v35 = vmov 1326507024   ;;  %s601_s15 = sshll.u32 %s268_s14, 3 }
  0x29   : > { %s274_s26 = scalar_lea.vmem %s975_s0, %s602_s18  ;;  %s278_s9 = scalar_lea.vmem %s976_s1, %s602_s18 }
  0x2a   : > { %v280_v2 = vld [vmem:[%s278_s9] sm:$0xff]  ;;  %s613_s18 = sshll.u32 %s857_s25, 7  ;;  %s270_s19 = scalar_lea.vmem [#allocation5], %s601_s15 }
  0x2b   : > { %367 = vperm.xlu0 %691, %v280_v2   ;;  %v279_v5 = vld [vmem:[%s274_s26] sm:$0xff]  ;;  %s512_s20 = sshll.u32 %s270_s19, 4  ;;  %s510_s29 = scalar_lea.hbm %s981_s6, %s613_s18  ;;  %s513_s20 = int_to_ptr.vmem [resolvable:$true] %s512_s20 }
  0x2c   : > { %624 = vmatmul.mubr.msk.f32.vlgmr.msra.gmra.mxu0 %vm290_vm1, %v279_v5  ;;  %s499_s9 = scalar_lea.sflag [#allocation4], %s268_s14  ;;  %s722_s10 = scalar_lea.vmem %s513_s20, 128 }
  0x2d   : > { %p723_p6 = scmp.ne.s32.totalorder %s513_s20, %s722_s10  ;;  %s800_s25 = smov [#allocation5]  }
  0x2e   : > { %s726_s11 = sshll.u32 %s800_s25, 4  ;;  %s727_s11 = int_to_ptr.vmem [resolvable:$false] %s726_s11 }
  0x2f   : > { %p724_p9 = pnand %p723_p6, %p874_p5  ;;  %s728_s12 = scalar_lea.vmem %s727_s11, 256 }
  0x30   : > { %p729_p11 = scmp.lt.s32.totalorder %s513_s20, %s727_s11  ;;  %p730_p12 = scmp.lt.s32.totalorder %s728_s12, %s722_s10 }
  0x31   : > { %p725_p10 = pneg %p724_p9 }
  0x32   : > { %p731_p13 = por %p730_p12, %p729_p11 }
  0x34   : > { %p732_p0 = pnand %p731_p13, %p725_p10 }
  0xa6   : > { %v368_v8 = vpop.permute.xlu0 %367 }
  0xa7   : > { %v376_v9 = vmul.f32 %v606_v6, %v368_v8 }
  0xa9   : > { %v916_v10 = vadd.f32 %v607_v7, %v376_v9 }
  0xab   : > { %v391_v11 = vand.u32 2139095040, %v916_v10  ;;  %v388_v15 = vand.u32 2147483647, %v916_v10  ;;  %vm390_vm9 = vcmp.lt.s32.totalorder %v916_v10, 0  ;;  %vm480_vm15 = vweird.f32 %v916_v10 }
  0xad   : > { %v392_v12 = vshrl.u32 %v391_v11, 23  ;;  %v395_v19 = vand.u32 8388607, %v388_v15  ;;  %vm389_vm10 = vcmp.le.f32.partialorder %v388_v15, 0.7853982 }
  0xae   : > { %v604_v15 = vld [vmem:[%s978_s3] ss:$0 sm:$0xff] }
  0xaf   : > { %v608_v13 = vadd.s32 4294967169, %v392_v12  ;;  %v396_v37 = vor.u32 8388608, %v395_v19 }
  0xb1   : > { %v398_v14 = vadd.s32 1, %v608_v13  ;;  %v436_v51 = vshll.u32 %v396_v37, 8 }
  0xb3   : > { %vm399_vm2 = vcmp.gt.s32.totalorder %v398_v14, 0 }
  0xb4   : > { %v400_v16 = vsel %vm399_vm2, %v398_v14, 0 }
  0xb5   : > { %v402_v17 = vand.u32 31, %v400_v16  ;;  %v401_v20 = vshrl.u32 %v400_v16, 5 }
  0xb7   : > { %v403_v18 = vsub.s32 32, %v402_v17  ;;  %v405_v22 = vshll.u32 %v794_v21, %v402_v17  ;;  %v408_v24 = vshll.u32 %v795_v23, %v402_v17  ;;  %v411_v28 = vshll.u32 %v796_v26, %v402_v17 }
  0xb8   : > { %v414_v31 = vshll.u32 %v797_v29, %v402_v17  ;;  %v417_v34 = vshll.u32 %v798_v32, %v402_v17  ;;  %vm420_vm3 = vcmp.lt.s32.totalorder %v401_v20, 1  ;;  %vm423_vm4 = vcmp.lt.s32.totalorder %v401_v20, 4 }
  0xb9   : > { %v406_v25 = vshrl.u32 %v795_v23, %v403_v18  ;;  %v409_v27 = vshrl.u32 %v796_v26, %v403_v18  ;;  %v412_v30 = vshrl.u32 %v797_v29, %v403_v18  ;;  %v415_v33 = vshrl.u32 %v798_v32, %v403_v18 }
  0xba   : > { %v418_v36 = vshrl.u32 %v799_v35, %v403_v18  ;;  %v404_v46 = vshrl.u32 %v794_v21, %v403_v18  ;;  %vm422_vm5 = vcmp.lt.s32.totalorder %v401_v20, 3  ;;  %vm421_vm6 = vcmp.lt.s32.totalorder %v401_v20, 2 }
  0xbb   : > { %v407_v38 = vor.u32 %v406_v25, %v405_v22  ;;  %v410_v39 = vor.u32 %v409_v27, %v408_v24  ;;  %v413_v40 = vor.u32 %v412_v30, %v411_v28  ;;  %v416_v41 = vor.u32 %v415_v33, %v414_v31 }
  0xbc   : > { %v419_v42 = vor.u32 %v418_v36, %v417_v34  ;;  %v385_v33 = vlaneseq }
  0xbd   : > { %v425_v43 = vsel %vm423_vm4, %v413_v40, 2102212464  ;;  %v428_v44 = vsel %vm420_vm3, %v407_v38, %v410_v39  ;;  %v432_v45 = vsel %vm420_vm3, %v410_v39, %v413_v40  ;;  %v429_v47 = vsel %vm423_vm4, %v416_v41, 920167782 }
  0xbe   : > { %v433_v48 = vsel %vm423_vm4, %v419_v42, 1326507024  ;;  %v430_v49 = vsel %vm422_vm5, %v413_v40, %v429_v47  ;;  %v424_v52 = vsel %vm420_vm3, %v404_v46, %v407_v38  ;;  %v426_v53 = vsel %vm422_vm5, %v410_v39, %v425_v43 }
  0xbf   : > { %v434_v50 = vsel %vm422_vm5, %v416_v41, %v433_v48  ;;  %v431_v54 = vsel %vm421_vm6, %v428_v44, %v430_v49  ;;  %v427_v60 = vsel %vm421_vm6, %v424_v52, %v426_v53  ;;  %v386_v36 = vand.u32 127, %v385_v33 }
  0xc0   : > { %v435_v55 = vsel %vm421_vm6, %v432_v45, %v434_v50  ;;  %v925_v58 = vmul.u32.u64.low %v436_v51, %v431_v54  ;;  %v926_v59 = vmul.u32.u64.high %v436_v51, %v431_v54, %v925_v58  ;;  %v443_v62 = vmul.u32 %v436_v51, %v427_v60 }
  0xc1   : > { %v922_v56 = vmul.u32.u64.low %v436_v51, %v435_v55  ;;  %v923_v57 = vmul.u32.u64.high %v436_v51, %v435_v55, %v922_v56  ;;  %vm387_vm13 = vcmp.eq.s32.totalorder %v386_v36, 0 }
  0xc2   : > { %v446_v61 = vadd.s32 1, %v926_v59 }
  0xc3   : > { %vm445_vm7 = vc.u32 %v923_v57, %v925_v58  ;;  %v444_v11 = vadd.s32 %v925_v58, %v923_v57 }
  0xc4   : > { %v447_v63 = vsel %vm445_vm7, %v446_v61, %v926_v59 }
  0xc5   : > { %v448_v0 = vadd.s32 %v447_v63, %v443_v62 }
  0xc7   : > { %v449_v1 = vadd.s32 536870912, %v448_v0 }
  0xc9   : > { %v450_v2 = vshrl.u32 %v449_v1, 30 }
  0xcb   : > { %v451_v3 = vshll.u32 %v450_v2, 30  ;;  %v474_v25 = vsub.s32 4, %v450_v2 }
  0xcd   : > { %v452_v4 = vsub.s32 %v448_v0, %v451_v3  ;;  %v475_v28 = vsel %vm390_vm9, %v474_v25, %v450_v2 }
  0xce   : > { %v477_v30 = vsel %vm389_vm10, 0, %v475_v28 }
  0xcf   : > { %v454_v5 = vsub.s32 0, %v452_v4  ;;  %v481_v32 = vadd.s32 3, %v477_v30 }
  0xd1   : > { %v609_v6 = vmin.u32 %v454_v5, %v452_v4  ;;  %v482_v34 = vand.u32 3, %v481_v32 }
  0xd3   : > { %v456_v7 = vclz %v609_v6  ;;  %vm487_vm11 = vcmp.eq.s32.totalorder %v482_v34, 2  ;;  %vm484_vm12 = vcmp.eq.s32.totalorder %v482_v34, 0  ;;  %vm483_vm14 = vcmp.lt.s32.totalorder %v482_v34, 2 }
  0xd5   : > { %v610_v8 = vadd.s32 4294967294, %v456_v7 }
  0xd7   : > { %vm611_vm8 = vcmp.lt.s32.totalorder %v610_v8, 0 }
  0xd8   : > { %v459_v9 = vsel %vm611_vm8, 0, %v610_v8 }
  0xd9   : > { %v460_v12 = vsub.s32 32, %v459_v9  ;;  %v464_v13 = vsub.s32 4294967266, %v459_v9  ;;  %v461_v14 = vshll.u32 %v452_v4, %v459_v9 }
  0xdb   : > { %v462_v16 = vshrl.u32 %v444_v11, %v460_v12  ;;  %v465_v17 = vadd.s32 127, %v464_v13 }
  0xdd   : > { %v463_v18 = vor.u32 %v462_v16, %v461_v14  ;;  %v466_v19 = vshll.u32 %v465_v17, 23 }
  0xdf   : > { %v467_v20 = vor.u32 4788187, %v466_v19  ;;  %v470_v22 = vcvt.s32.f32 %v463_v18 }
  0xe1   : > { %v468_v21 = vand.u32 2147483647, %v467_v20 }
  0xe3   : > { %v471_v23 = vmul.f32 %v470_v22, %v468_v21 }
  0xe5   : > { %v472_v24 = vxor.u32 2147483648, %v471_v23 }
  0xe7   : > { %v473_v26 = vsel %vm390_vm9, %v472_v24, %v471_v23 }
  0xe8   : > { %v476_v27 = vsel %vm389_vm10, %v916_v10, %v473_v26 }
  0xe9   : > { %692 = vcosq.f32 %v476_v27 }
  0xea   : > { %694 = vsinq.f32 %v476_v27 }
  0xec   : > { %v360_v29 = vpop.f32.mrf.mxu0 }
  0xed   : > { %v361_v41 = vadd.f32 %v604_v15, %v360_v29 }
  0xee   : > { %v625_v31 = vpop.f32.mrf.mxu0 }
  0xf6   : > { %v693_v35 = vpop.eup %692 }
  0xf7   : > { %v695_v37 = vpop.eup %694  ;;  %v488_v38 = vxor.u32 2147483648, %v693_v35 }
  0xf8   : > { %v485_v39 = vxor.u32 2147483648, %v695_v37 }
  0xf9   : > { %v489_v40 = vsel %vm487_vm11, %v488_v38, %v695_v37 }
  0xfa   : > { %v486_v42 = vsel %vm484_vm12, %v693_v35, %v485_v39 }
  0xfb   : > { %v490_v43 = vsel %vm483_vm14, %v486_v42, %v489_v40 }
  0xfc   : > { %v491_v44 = vsel %vm480_vm15, nan, %v490_v43 }
  0xfd   : > { %v494_v45 = vsel %vm387_vm13, %v916_v10, %v491_v44 }
  0xfe   : > { %v495_v46 = vadd.f32 %v494_v45, %v361_v41 }
 0x100   : > { %497 = vst.msk [vmem:[%s270_s19] sm:$0xff] %vm496_vm0, %v495_v46 }
 0x101   : > { %735 = shalt.err (!%p732_p0)
}
 0x102   : > { %s736_s13 = scalar_lea.hbm %s510_s29, 128  ;;  %s740_s16 = scalar_lea.hbm %s981_s6, 256 }
 0x103   : > { %p737_p1 = scmp.ne.s32.totalorder %s510_s29, %s736_s13  ;;  %p741_p4 = scmp.lt.s32.totalorder %s510_s29, %s981_s6 }
 0x104   : > { %p742_p7 = scmp.lt.s32.totalorder %s740_s16, %s736_s13 }
 0x105   : > { %p738_p2 = pnand %p737_p1, %p874_p5 }
 0x106   : > { %p743_p8 = por %p742_p7, %p741_p4 }
 0x107   : > { %p739_p3 = pneg %p738_p2 }
 0x109   : > { %p744_p6 = pnand %p743_p8, %p739_p3 }
 0x10b   : > { %747 = shalt.err (!%p744_p6)
}
 0x10c   : > { %634 = dma.vmem_to_hbm [thread:$0]  (%p874_p5), %s513_s20, 128, %s510_s29, %s499_s9  }
 0x10d PF: > { %p646_p9 = scmp.ge.s32.totalorder %s786_s24, 2  ;;  %s524_s19 = sand.u32 1, %s774_s21  }
 0x10e   : > { %p985_p10 = scmp.ne.s32.totalorder %s983_s8, 0  ;;  %s525_s26 = scalar_lea.sflag [#allocation4], %s524_s19 }
 0x110   : > { %p641_p11 = pnand %p646_p9, %p985_p10 }
 0x112   : > { %p642_p12 = pneg %p641_p11 }
 0x114   : > { %769 = dma.done.wait (%p642_p12), %s525_s26, 128  }
 0x115   : > { %771 = vsyncadd (%p642_p12), %s525_s26, 4294967168  ;;  %p17_p13 = scmp.ge.s32.totalorder %s861_s27, 4   ;;  %s986_s21 = smov %s778_s22 }
 0x116   : > { %s987_s22 = smov %s782_s23  ;;  %s988_s23 = smov %s872_s30 }
 0x117   : > { %s989_s24 = smov %s861_s27  ;;  %19 = sbr.rel (!%p17_p13) target bundleno = 4 (0x4), region = 87 }
 0x11c   :  { %530 = vsyncpa [#allocation3], 1 }
 0x11d   :  { %532 = vsyncpa [#allocation3 + $0x1], 1 }
 0x11e   :  { %533 = vsyncpa [#allocation4], 1 }
 0x11f   :  { %535 = vsyncpa [#allocation4 + $0x1], 1 }

</bundles_post_ra>
